<compile_context>
chip_gen: v7x
topology: tpu7x:2x2x1
jax: 0.10.0
libtpu: 0.0.40
codegen_flags: <defaults>
</compile_context>

<pallas_src>
import functools

import numpy as np
import jax
import jax.numpy as jnp
from jax.experimental import pallas as pl
from jax.experimental.pallas import tpu as pltpu


# ----------------------------- trace-time constants -----------------------------


def _bilinear_matrix_np(in_len, out_len):
    """Interpolation matrix for bilinear upsampling with align_corners=True."""
    m = np.zeros((out_len, in_len), np.float32)
    if in_len == 1:
        m[:, 0] = 1.0
        return m
    if out_len == 1:
        m[0, 0] = 1.0
        return m
    coords = np.arange(out_len, dtype=np.float64) * (in_len - 1) / (out_len - 1)
    lo = np.clip(np.floor(coords).astype(np.int64), 0, in_len - 1)
    hi = np.clip(lo + 1, 0, in_len - 1)
    frac = (coords - lo).astype(np.float32)
    for i in range(out_len):
        m[i, lo[i]] += 1.0 - frac[i]
        m[i, hi[i]] += frac[i]
    return m


def _tap_masks_np(H, W):
    """(9, H*W) validity masks for the 9 taps of a zero-padded 3x3 conv."""
    m = np.zeros((9, H * W), np.float32)
    h = np.arange(H * W) // W
    w = np.arange(H * W) % W
    for kh in range(3):
        for kw in range(3):
            valid = ((h + kh - 1 >= 0) & (h + kh - 1 < H) &
                     (w + kw - 1 >= 0) & (w + kw - 1 < W))
            m[kh * 3 + kw] = valid.astype(np.float32)
    return m


# --------------------------------- Pallas kernel ---------------------------------


def _upconv_pos_kernel(*refs, slope, W, has_resize):
    if has_resize:
        (x_ref, up_ref, pos_ref, mask_ref,
         wr_ref, br_ref, w1_ref, b1_ref, w2_ref, b2_ref, o_ref) = refs
    else:
        (x_ref, up_ref, pos_ref, mask_ref,
         w1_ref, b1_ref, w2_ref, b2_ref, o_ref) = refs

    HW = o_ref.shape[2]
    masks = mask_ref[...]                                    # (9, HW)

    # Bilinear upsample (align_corners=True) as one MXU matmul:
    # (Cin, HW_in) @ (HW_in, HW) -> (Cin, HW), spatial on the lane axis.
    x_up = jnp.dot(x_ref[0], up_ref[...], preferred_element_type=jnp.float32)

    # Skip path: weight-normed 1x1 conv (identity when Cin == Cout).
    if has_resize:
        x_skip = jnp.dot(wr_ref[...], x_up,
                         preferred_element_type=jnp.float32) + br_ref[...]
    else:
        x_skip = x_up

    # Concat the positional encoding along the channel (sublane) axis.
    xc = jnp.concatenate([x_up, pos_ref[...]], axis=0)       # (Cin + P, HW)

    def im2col_3x3(a):
        # (C, HW) -> (9*C, HW): per-tap static lane roll (XLU) + boundary mask.
        # The flattened roll aliases row-wrapped / out-of-image positions, and
        # the mask zeroes exactly those, reproducing a zero-padded 3x3 window.
        cols = []
        for kh in range(3):
            for kw in range(3):
                d = (kh - 1) * W + (kw - 1)
                t = a if d == 0 else pltpu.roll(a, (-d) % HW, axis=1)
                cols.append(t * masks[kh * 3 + kw:kh * 3 + kw + 1, :])
        return jnp.concatenate(cols, axis=0)

    def lrelu(y):
        return jnp.where(y > 0, y, slope * y)

    # conv1 (3x3, pad 1) + bias + LeakyReLU: one matmul, K = 9*(Cin+P).
    h1 = jnp.dot(w1_ref[...], im2col_3x3(xc),
                 preferred_element_type=jnp.float32) + b1_ref[...]
    h1 = lrelu(h1)

    # conv2 (3x3, pad 1) + bias + LeakyReLU: one matmul, K = 9*Cmid.
    h2 = jnp.dot(w2_ref[...], im2col_3x3(h1),
                 preferred_element_type=jnp.float32) + b2_ref[...]
    h2 = lrelu(h2)

    # Residual add with the skip path; lane-dense (HW on lanes) store.
    o_ref[0] = (h2 + x_skip).astype(o_ref.dtype)


# ------------------------------------ wrapper ------------------------------------


def _weight_norm(v, g):
    """PyTorch weight_norm with dim=0: w = g * v / ||v|| (norm over dims > 0)."""
    nrm = jnp.sqrt(jnp.sum(v * v, axis=tuple(range(1, v.ndim)), keepdims=True))
    return g * v / nrm


def upconv_block_positional(x_nchw, pos_map, params, lrelu_slope=0.2):
    """Forward pass of UpConvBlockPositional. x: (N, Cin, H, W) -> (N, Cout, S, S)."""
    N, Cin, H_in, W_in = x_nchw.shape
    P, size, size2 = pos_map.shape
    assert size == size2
    Cmid = params["conv1_v"].shape[0]           # == in_channels
    Cout = params["conv2_v"].shape[0]
    C1 = Cin + P
    HW = size * size
    has_resize = Cin != Cout

    # Constant matrices (numpy; depend only on shapes, folded at trace time).
    Ah = _bilinear_matrix_np(H_in, size)                           # (size, H_in)
    Aw = _bilinear_matrix_np(W_in, size)                           # (size, W_in)
    up_T = jnp.asarray(np.kron(Ah, Aw).T, jnp.float32)             # (Hin*Win, HW)
    masks = jnp.asarray(_tap_masks_np(size, size), jnp.float32)    # (9, HW)

    # Weight-norm + layout prep (OIHW -> (O, 9*I), tap-major to match im2col).
    w1 = _weight_norm(params["conv1_v"], params["conv1_g"])        # (Cmid, C1, 3, 3)
    w1m = jnp.transpose(w1, (0, 2, 3, 1)).reshape(Cmid, 9 * C1)
    b1 = params["conv1_b"].reshape(Cmid, 1)
    w2 = _weight_norm(params["conv2_v"], params["conv2_g"])        # (Cout, Cmid, 3, 3)
    w2m = jnp.transpose(w2, (0, 2, 3, 1)).reshape(Cout, 9 * Cmid)
    b2 = params["conv2_b"].reshape(Cout, 1)

    x_flat = x_nchw.reshape(N, Cin, H_in * W_in)
    pos_flat = pos_map.reshape(P, HW)

    in_specs = [
        pl.BlockSpec((1, Cin, H_in * W_in), lambda n: (n, 0, 0)),
        pl.BlockSpec((H_in * W_in, HW), lambda n: (0, 0)),
        pl.BlockSpec((P, HW), lambda n: (0, 0)),
        pl.BlockSpec((9, HW), lambda n: (0, 0)),
    ]
    args = [x_flat, up_T, pos_flat, masks]
    if has_resize:
        wr = _weight_norm(params["resize_v"], params["resize_g"])[:, :, 0, 0]
        br = params["resize_b"].reshape(Cout, 1)
        in_specs += [pl.BlockSpec((Cout, Cin), lambda n: (0, 0)),
                     pl.BlockSpec((Cout, 1), lambda n: (0, 0))]
        args += [wr, br]
    in_specs += [pl.BlockSpec((Cmid, 9 * C1), lambda n: (0, 0)),
                 pl.BlockSpec((Cmid, 1), lambda n: (0, 0)),
                 pl.BlockSpec((Cout, 9 * Cmid), lambda n: (0, 0)),
                 pl.BlockSpec((Cout, 1), lambda n: (0, 0))]
    args += [w1m, b1, w2m, b2]

    kern = functools.partial(_upconv_pos_kernel, slope=lrelu_slope,
                             W=size, has_resize=has_resize)

    out = pl.pallas_call(
        kern,
        out_shape=jax.ShapeDtypeStruct((N, Cout, HW), x_nchw.dtype),
        grid=(N,),
        in_specs=in_specs,
        out_specs=pl.BlockSpec((1, Cout, HW), lambda n: (n, 0, 0)),
        compiler_params=pltpu.CompilerParams(
            dimension_semantics=("parallel",)),
    )(*args)
    return out.reshape(N, Cout, size, size)


# ------------------------------- pure-JAX reference -------------------------------


def _reference(x, pos_map, params, slope):
    N, Cin, H_in, W_in = x.shape
    P, size, _ = pos_map.shape
    Ah = jnp.asarray(_bilinear_matrix_np(H_in, size))
    Aw = jnp.asarray(_bilinear_matrix_np(W_in, size))
    x_up = jnp.einsum("sh,nchw,tw->ncst", Ah, x, Aw,
                      precision=jax.lax.Precision.HIGHEST)
    wr = _weight_norm(params["resize_v"], params["resize_g"])[:, :, 0, 0]
    x_skip = (jnp.einsum("oi,nihw->nohw", wr, x_up,
                         precision=jax.lax.Precision.HIGHEST)
              + params["resize_b"][None, :, None, None])
    xc = jnp.concatenate(
        [x_up, jnp.broadcast_to(pos_map[None], (N, P, size, size))], axis=1)

    def conv3(inp, w, b):
        y = jax.lax.conv_general_dilated(
            inp, w, (1, 1), "SAME",
            dimension_numbers=("NCHW", "OIHW", "NCHW"),
            precision=jax.lax.Precision.HIGHEST)
        return y + b[None, :, None, None]

    h = conv3(xc, _weight_norm(params["conv1_v"], params["conv1_g"]),
              params["conv1_b"])
    h = jnp.where(h > 0, h, slope * h)
    h = conv3(h, _weight_norm(params["conv2_v"], params["conv2_g"]),
              params["conv2_b"])
    h = jnp.where(h > 0, h, slope * h)
    return h + x_skip


# --------------------------------------- main ---------------------------------------


if __name__ == "__main__":
    in_channels, out_channels, P, size = 4, 8, 4, 16
    N, H_in, W_in = 2, 8, 8

    keys = jax.random.split(jax.random.PRNGKey(0), 11)

    def rnd(k, shape, scale=0.1):
        return scale * jax.random.normal(k, shape, dtype=jnp.float32)

    params = {
        "resize_v": rnd(keys[0], (out_channels, in_channels, 1, 1)),
        "resize_g": 1.0 + rnd(keys[1], (out_channels, 1, 1, 1)),
        "resize_b": rnd(keys[2], (out_channels,)),
        "conv1_v": rnd(keys[3], (in_channels, in_channels + P, 3, 3)),
        "conv1_g": 1.0 + rnd(keys[4], (in_channels, 1, 1, 1)),
        "conv1_b": rnd(keys[5], (in_channels,)),
        "conv2_v": rnd(keys[6], (out_channels, in_channels, 3, 3)),
        "conv2_g": 1.0 + rnd(keys[7], (out_channels, 1, 1, 1)),
        "conv2_b": rnd(keys[8], (out_channels,)),
    }
    pos_map = jax.random.normal(keys[9], (P, size, size), dtype=jnp.float32)
    x = jax.random.normal(keys[10], (N, in_channels, H_in, W_in), dtype=jnp.float32)

    fwd = jax.jit(lambda xi, pos, p: upconv_block_positional(xi, pos, p,
                                                             lrelu_slope=0.2))
    out = jax.block_until_ready(fwd(x, pos_map, params))
    assert out.shape == (N, out_channels, size, size), out.shape
    assert out.dtype == jnp.float32

    ref = jax.block_until_ready(_reference(x, pos_map, params, 0.2))
    assert np.allclose(np.asarray(out), np.asarray(ref), atol=5e-2, rtol=5e-2), \
        float(np.max(np.abs(np.asarray(out) - np.asarray(ref))))

    print("KERNEL_OK")
</pallas_src>

<mosaic_0001>
module attributes {stable_mosaic.version = 11 : i64} {
  func.func @_upconv_pos_kernel(%arg0: i32, %arg1: memref<1x4x64xf32, #tpu.memory_space<vmem>>, %arg2: memref<64x256xf32, #tpu.memory_space<vmem>>, %arg3: memref<4x256xf32, #tpu.memory_space<vmem>>, %arg4: memref<9x256xf32, #tpu.memory_space<vmem>>, %arg5: memref<8x4xf32, #tpu.memory_space<vmem>>, %arg6: memref<8x1xf32, #tpu.memory_space<vmem>>, %arg7: memref<4x72xf32, #tpu.memory_space<vmem>>, %arg8: memref<4x1xf32, #tpu.memory_space<vmem>>, %arg9: memref<8x36xf32, #tpu.memory_space<vmem>>, %arg10: memref<8x1xf32, #tpu.memory_space<vmem>>, %arg11: memref<1x8x256xf32, #tpu.memory_space<vmem>>) attributes {dimension_semantics = [#tpu.dimension_semantics<parallel>], iteration_bounds = array<i64: 2>, scalar_prefetch = 0 : i64, scratch_operands = 0 : i64, tpu.core_type = #tpu.core_type<tc>, window_params = [{transform_indices = @transform_0, window_bounds = array<i64: 1, 4, 64>}, {pipeline_mode = #tpu.pipeline_mode<synchronous>, transform_indices = @transform_1, window_bounds = array<i64: 64, 256>}, {pipeline_mode = #tpu.pipeline_mode<synchronous>, transform_indices = @transform_2, window_bounds = array<i64: 4, 256>}, {pipeline_mode = #tpu.pipeline_mode<synchronous>, transform_indices = @transform_3, window_bounds = array<i64: 9, 256>}, {pipeline_mode = #tpu.pipeline_mode<synchronous>, transform_indices = @transform_4, window_bounds = array<i64: 8, 4>}, {pipeline_mode = #tpu.pipeline_mode<synchronous>, transform_indices = @transform_5, window_bounds = array<i64: 8, 1>}, {pipeline_mode = #tpu.pipeline_mode<synchronous>, transform_indices = @transform_6, window_bounds = array<i64: 4, 72>}, {pipeline_mode = #tpu.pipeline_mode<synchronous>, transform_indices = @transform_7, window_bounds = array<i64: 4, 1>}, {pipeline_mode = #tpu.pipeline_mode<synchronous>, transform_indices = @transform_8, window_bounds = array<i64: 8, 36>}, {pipeline_mode = #tpu.pipeline_mode<synchronous>, transform_indices = @transform_9, window_bounds = array<i64: 8, 1>}, {transform_indices = @transform_10, window_bounds = array<i64: 1, 8, 256>}]} {
    %c0 = arith.constant 0 : index
    %c0_0 = arith.constant 0 : index
    %0 = vector.load %arg4[%c0, %c0_0] : memref<9x256xf32, #tpu.memory_space<vmem>>, vector<9x256xf32>
    %c0_1 = arith.constant 0 : index
    %c0_2 = arith.constant 0 : index
    %c0_3 = arith.constant 0 : index
    %1 = vector.load %arg1[%c0_1, %c0_2, %c0_3] : memref<1x4x64xf32, #tpu.memory_space<vmem>>, vector<1x4x64xf32>
    %2 = vector.shape_cast %1 : vector<1x4x64xf32> to vector<4x64xf32>
    %c0_4 = arith.constant 0 : index
    %c0_5 = arith.constant 0 : index
    %3 = vector.load %arg2[%c0_4, %c0_5] : memref<64x256xf32, #tpu.memory_space<vmem>>, vector<64x256xf32>
    %cst = arith.constant dense<0.000000e+00> : vector<4x256xf32>
    %4 = tpu.matmul %2, %3, %cst {dimension_numbers = #tpu.dot_dimension_numbers<[1], [0], [0], [1], [0, 0, 1, 1], [], []>} : vector<4x64xf32>, vector<64x256xf32>, vector<4x256xf32> -> vector<4x256xf32>
    %c0_6 = arith.constant 0 : index
    %c0_7 = arith.constant 0 : index
    %5 = vector.load %arg5[%c0_6, %c0_7] : memref<8x4xf32, #tpu.memory_space<vmem>>, vector<8x4xf32>
    %cst_8 = arith.constant dense<0.000000e+00> : vector<8x256xf32>
    %6 = tpu.matmul %5, %4, %cst_8 {dimension_numbers = #tpu.dot_dimension_numbers<[1], [0], [0], [1], [0, 0, 1, 1], [], []>} : vector<8x4xf32>, vector<4x256xf32>, vector<8x256xf32> -> vector<8x256xf32>
    %c0_9 = arith.constant 0 : index
    %c0_10 = arith.constant 0 : index
    %7 = vector.load %arg6[%c0_9, %c0_10] : memref<8x1xf32, #tpu.memory_space<vmem>>, vector<8x1xf32>
    %8 = vector.broadcast %7 : vector<8x1xf32> to vector<8x256xf32>
    %9 = arith.addf %6, %8 : vector<8x256xf32>
    %c0_11 = arith.constant 0 : index
    %c0_12 = arith.constant 0 : index
    %10 = vector.load %arg3[%c0_11, %c0_12] : memref<4x256xf32, #tpu.memory_space<vmem>>, vector<4x256xf32>
    %11 = tpu.concatenate %4, %10 in 0 : vector<4x256xf32>, vector<4x256xf32> -> vector<8x256xf32>
    %c0_13 = arith.constant 0 : index
    %c0_14 = arith.constant 0 : index
    %12 = vector.load %arg7[%c0_13, %c0_14] : memref<4x72xf32, #tpu.memory_space<vmem>>, vector<4x72xf32>
    %c17_i32 = arith.constant 17 : i32
    %13 = tpu.dynamic_rotate %11 by %c17_i32 dim 1 : vector<8x256xf32>, i32 -> vector<8x256xf32>
    %14 = vector.extract_strided_slice %0 {offsets = [0, 0], sizes = [1, 256], strides = [1, 1]} : vector<9x256xf32> to vector<1x256xf32>
    %15 = vector.broadcast %14 : vector<1x256xf32> to vector<8x256xf32>
    %16 = arith.mulf %13, %15 : vector<8x256xf32>
    %c16_i32 = arith.constant 16 : i32
    %17 = tpu.dynamic_rotate %11 by %c16_i32 dim 1 : vector<8x256xf32>, i32 -> vector<8x256xf32>
    %18 = vector.extract_strided_slice %0 {offsets = [1, 0], sizes = [1, 256], strides = [1, 1]} : vector<9x256xf32> to vector<1x256xf32>
    %19 = vector.broadcast %18 : vector<1x256xf32> to vector<8x256xf32>
    %20 = arith.mulf %17, %19 : vector<8x256xf32>
    %c15_i32 = arith.constant 15 : i32
    %21 = tpu.dynamic_rotate %11 by %c15_i32 dim 1 : vector<8x256xf32>, i32 -> vector<8x256xf32>
    %22 = vector.extract_strided_slice %0 {offsets = [2, 0], sizes = [1, 256], strides = [1, 1]} : vector<9x256xf32> to vector<1x256xf32>
    %23 = vector.broadcast %22 : vector<1x256xf32> to vector<8x256xf32>
    %24 = arith.mulf %21, %23 : vector<8x256xf32>
    %c1_i32 = arith.constant 1 : i32
    %25 = tpu.dynamic_rotate %11 by %c1_i32 dim 1 : vector<8x256xf32>, i32 -> vector<8x256xf32>
    %26 = vector.extract_strided_slice %0 {offsets = [3, 0], sizes = [1, 256], strides = [1, 1]} : vector<9x256xf32> to vector<1x256xf32>
    %27 = vector.broadcast %26 : vector<1x256xf32> to vector<8x256xf32>
    %28 = arith.mulf %25, %27 : vector<8x256xf32>
    %29 = vector.extract_strided_slice %0 {offsets = [4, 0], sizes = [1, 256], strides = [1, 1]} : vector<9x256xf32> to vector<1x256xf32>
    %30 = vector.broadcast %29 : vector<1x256xf32> to vector<8x256xf32>
    %31 = arith.mulf %11, %30 : vector<8x256xf32>
    %c255_i32 = arith.constant 255 : i32
    %32 = tpu.dynamic_rotate %11 by %c255_i32 dim 1 : vector<8x256xf32>, i32 -> vector<8x256xf32>
    %33 = vector.extract_strided_slice %0 {offsets = [5, 0], sizes = [1, 256], strides = [1, 1]} : vector<9x256xf32> to vector<1x256xf32>
    %34 = vector.broadcast %33 : vector<1x256xf32> to vector<8x256xf32>
    %35 = arith.mulf %32, %34 : vector<8x256xf32>
    %c241_i32 = arith.constant 241 : i32
    %36 = tpu.dynamic_rotate %11 by %c241_i32 dim 1 : vector<8x256xf32>, i32 -> vector<8x256xf32>
    %37 = vector.extract_strided_slice %0 {offsets = [6, 0], sizes = [1, 256], strides = [1, 1]} : vector<9x256xf32> to vector<1x256xf32>
    %38 = vector.broadcast %37 : vector<1x256xf32> to vector<8x256xf32>
    %39 = arith.mulf %36, %38 : vector<8x256xf32>
    %c240_i32 = arith.constant 240 : i32
    %40 = tpu.dynamic_rotate %11 by %c240_i32 dim 1 : vector<8x256xf32>, i32 -> vector<8x256xf32>
    %41 = vector.extract_strided_slice %0 {offsets = [7, 0], sizes = [1, 256], strides = [1, 1]} : vector<9x256xf32> to vector<1x256xf32>
    %42 = vector.broadcast %41 : vector<1x256xf32> to vector<8x256xf32>
    %43 = arith.mulf %40, %42 : vector<8x256xf32>
    %c239_i32 = arith.constant 239 : i32
    %44 = tpu.dynamic_rotate %11 by %c239_i32 dim 1 : vector<8x256xf32>, i32 -> vector<8x256xf32>
    %45 = vector.extract_strided_slice %0 {offsets = [8, 0], sizes = [1, 256], strides = [1, 1]} : vector<9x256xf32> to vector<1x256xf32>
    %46 = vector.broadcast %45 : vector<1x256xf32> to vector<8x256xf32>
    %47 = arith.mulf %44, %46 : vector<8x256xf32>
    %48 = tpu.concatenate %16, %20, %24, %28, %31, %35, %39, %43, %47 in 0 : vector<8x256xf32>, vector<8x256xf32>, vector<8x256xf32>, vector<8x256xf32>, vector<8x256xf32>, vector<8x256xf32>, vector<8x256xf32>, vector<8x256xf32>, vector<8x256xf32> -> vector<72x256xf32>
    %cst_15 = arith.constant dense<0.000000e+00> : vector<4x256xf32>
    %49 = tpu.matmul %12, %48, %cst_15 {dimension_numbers = #tpu.dot_dimension_numbers<[1], [0], [0], [1], [0, 0, 1, 1], [], []>} : vector<4x72xf32>, vector<72x256xf32>, vector<4x256xf32> -> vector<4x256xf32>
    %c0_16 = arith.constant 0 : index
    %c0_17 = arith.constant 0 : index
    %50 = vector.load %arg8[%c0_16, %c0_17] : memref<4x1xf32, #tpu.memory_space<vmem>>, vector<4x1xf32>
    %51 = vector.broadcast %50 : vector<4x1xf32> to vector<4x256xf32>
    %52 = arith.addf %49, %51 : vector<4x256xf32>
    %cst_18 = arith.constant 0.000000e+00 : f32
    %53 = vector.broadcast %cst_18 : f32 to vector<4x256xf32>
    %54 = arith.cmpf ogt, %52, %53 : vector<4x256xf32>
    %cst_19 = arith.constant 2.000000e-01 : f32
    %55 = vector.broadcast %cst_19 : f32 to vector<4x256xf32>
    %56 = arith.mulf %55, %52 : vector<4x256xf32>
    %57 = arith.select %54, %52, %56 : vector<4x256xi1>, vector<4x256xf32>
    %c0_20 = arith.constant 0 : index
    %c0_21 = arith.constant 0 : index
    %58 = vector.load %arg9[%c0_20, %c0_21] : memref<8x36xf32, #tpu.memory_space<vmem>>, vector<8x36xf32>
    %c17_i32_22 = arith.constant 17 : i32
    %59 = tpu.dynamic_rotate %57 by %c17_i32_22 dim 1 : vector<4x256xf32>, i32 -> vector<4x256xf32>
    %60 = vector.extract_strided_slice %0 {offsets = [0, 0], sizes = [1, 256], strides = [1, 1]} : vector<9x256xf32> to vector<1x256xf32>
    %61 = vector.broadcast %60 : vector<1x256xf32> to vector<4x256xf32>
    %62 = arith.mulf %59, %61 : vector<4x256xf32>
    %c16_i32_23 = arith.constant 16 : i32
    %63 = tpu.dynamic_rotate %57 by %c16_i32_23 dim 1 : vector<4x256xf32>, i32 -> vector<4x256xf32>
    %64 = vector.extract_strided_slice %0 {offsets = [1, 0], sizes = [1, 256], strides = [1, 1]} : vector<9x256xf32> to vector<1x256xf32>
    %65 = vector.broadcast %64 : vector<1x256xf32> to vector<4x256xf32>
    %66 = arith.mulf %63, %65 : vector<4x256xf32>
    %c15_i32_24 = arith.constant 15 : i32
    %67 = tpu.dynamic_rotate %57 by %c15_i32_24 dim 1 : vector<4x256xf32>, i32 -> vector<4x256xf32>
    %68 = vector.extract_strided_slice %0 {offsets = [2, 0], sizes = [1, 256], strides = [1, 1]} : vector<9x256xf32> to vector<1x256xf32>
    %69 = vector.broadcast %68 : vector<1x256xf32> to vector<4x256xf32>
    %70 = arith.mulf %67, %69 : vector<4x256xf32>
    %c1_i32_25 = arith.constant 1 : i32
    %71 = tpu.dynamic_rotate %57 by %c1_i32_25 dim 1 : vector<4x256xf32>, i32 -> vector<4x256xf32>
    %72 = vector.extract_strided_slice %0 {offsets = [3, 0], sizes = [1, 256], strides = [1, 1]} : vector<9x256xf32> to vector<1x256xf32>
    %73 = vector.broadcast %72 : vector<1x256xf32> to vector<4x256xf32>
    %74 = arith.mulf %71, %73 : vector<4x256xf32>
    %75 = vector.extract_strided_slice %0 {offsets = [4, 0], sizes = [1, 256], strides = [1, 1]} : vector<9x256xf32> to vector<1x256xf32>
    %76 = vector.broadcast %75 : vector<1x256xf32> to vector<4x256xf32>
    %77 = arith.mulf %57, %76 : vector<4x256xf32>
    %c255_i32_26 = arith.constant 255 : i32
    %78 = tpu.dynamic_rotate %57 by %c255_i32_26 dim 1 : vector<4x256xf32>, i32 -> vector<4x256xf32>
    %79 = vector.extract_strided_slice %0 {offsets = [5, 0], sizes = [1, 256], strides = [1, 1]} : vector<9x256xf32> to vector<1x256xf32>
    %80 = vector.broadcast %79 : vector<1x256xf32> to vector<4x256xf32>
    %81 = arith.mulf %78, %80 : vector<4x256xf32>
    %c241_i32_27 = arith.constant 241 : i32
    %82 = tpu.dynamic_rotate %57 by %c241_i32_27 dim 1 : vector<4x256xf32>, i32 -> vector<4x256xf32>
    %83 = vector.extract_strided_slice %0 {offsets = [6, 0], sizes = [1, 256], strides = [1, 1]} : vector<9x256xf32> to vector<1x256xf32>
    %84 = vector.broadcast %83 : vector<1x256xf32> to vector<4x256xf32>
    %85 = arith.mulf %82, %84 : vector<4x256xf32>
    %c240_i32_28 = arith.constant 240 : i32
    %86 = tpu.dynamic_rotate %57 by %c240_i32_28 dim 1 : vector<4x256xf32>, i32 -> vector<4x256xf32>
    %87 = vector.extract_strided_slice %0 {offsets = [7, 0], sizes = [1, 256], strides = [1, 1]} : vector<9x256xf32> to vector<1x256xf32>
    %88 = vector.broadcast %87 : vector<1x256xf32> to vector<4x256xf32>
    %89 = arith.mulf %86, %88 : vector<4x256xf32>
    %c239_i32_29 = arith.constant 239 : i32
    %90 = tpu.dynamic_rotate %57 by %c239_i32_29 dim 1 : vector<4x256xf32>, i32 -> vector<4x256xf32>
    %91 = vector.extract_strided_slice %0 {offsets = [8, 0], sizes = [1, 256], strides = [1, 1]} : vector<9x256xf32> to vector<1x256xf32>
    %92 = vector.broadcast %91 : vector<1x256xf32> to vector<4x256xf32>
    %93 = arith.mulf %90, %92 : vector<4x256xf32>
    %94 = tpu.concatenate %62, %66, %70, %74, %77, %81, %85, %89, %93 in 0 : vector<4x256xf32>, vector<4x256xf32>, vector<4x256xf32>, vector<4x256xf32>, vector<4x256xf32>, vector<4x256xf32>, vector<4x256xf32>, vector<4x256xf32>, vector<4x256xf32> -> vector<36x256xf32>
    %cst_30 = arith.constant dense<0.000000e+00> : vector<8x256xf32>
    %95 = tpu.matmul %58, %94, %cst_30 {dimension_numbers = #tpu.dot_dimension_numbers<[1], [0], [0], [1], [0, 0, 1, 1], [], []>} : vector<8x36xf32>, vector<36x256xf32>, vector<8x256xf32> -> vector<8x256xf32>
    %c0_31 = arith.constant 0 : index
    %c0_32 = arith.constant 0 : index
    %96 = vector.load %arg10[%c0_31, %c0_32] : memref<8x1xf32, #tpu.memory_space<vmem>>, vector<8x1xf32>
    %97 = vector.broadcast %96 : vector<8x1xf32> to vector<8x256xf32>
    %98 = arith.addf %95, %97 : vector<8x256xf32>
    %cst_33 = arith.constant 0.000000e+00 : f32
    %99 = vector.broadcast %cst_33 : f32 to vector<8x256xf32>
    %100 = arith.cmpf ogt, %98, %99 : vector<8x256xf32>
    %cst_34 = arith.constant 2.000000e-01 : f32
    %101 = vector.broadcast %cst_34 : f32 to vector<8x256xf32>
    %102 = arith.mulf %101, %98 : vector<8x256xf32>
    %103 = arith.select %100, %98, %102 : vector<8x256xi1>, vector<8x256xf32>
    %104 = arith.addf %103, %9 : vector<8x256xf32>
    %c0_35 = arith.constant 0 : index
    %c0_36 = arith.constant 0 : index
    %c0_37 = arith.constant 0 : index
    %105 = vector.load %arg11[%c0_35, %c0_36, %c0_37] : memref<1x8x256xf32, #tpu.memory_space<vmem>>, vector<1x8x256xf32>
    %106 = vector.shape_cast %105 : vector<1x8x256xf32> to vector<8x256xf32>
    %107 = vector.shape_cast %104 : vector<8x256xf32> to vector<1x8x256xf32>
    tpu.vector_store %arg11[%c0_35, %c0_36, %c0_37], %107 {strides = array<i32>} : memref<1x8x256xf32, #tpu.memory_space<vmem>>, vector<1x8x256xf32>,
    return
  }
  func.func @transform_0(%arg0: i32) -> (i32, i32, i32) {
    %c0_i32 = arith.constant 0 : i32
    %c0_i32_0 = arith.constant 0 : i32
    %c0_i32_1 = arith.constant 0 : i32
    return %arg0, %c0_i32, %c0_i32_0 : i32, i32, i32
  }
  func.func @transform_1(%arg0: i32) -> (i32, i32) {
    %c0_i32 = arith.constant 0 : i32
    %c0_i32_0 = arith.constant 0 : i32
    %c0_i32_1 = arith.constant 0 : i32
    return %c0_i32, %c0_i32_0 : i32, i32
  }
  func.func @transform_2(%arg0: i32) -> (i32, i32) {
    %c0_i32 = arith.constant 0 : i32
    %c0_i32_0 = arith.constant 0 : i32
    %c0_i32_1 = arith.constant 0 : i32
    return %c0_i32, %c0_i32_0 : i32, i32
  }
  func.func @transform_3(%arg0: i32) -> (i32, i32) {
    %c0_i32 = arith.constant 0 : i32
    %c0_i32_0 = arith.constant 0 : i32
    %c0_i32_1 = arith.constant 0 : i32
    return %c0_i32, %c0_i32_0 : i32, i32
  }
  func.func @transform_4(%arg0: i32) -> (i32, i32) {
    %c0_i32 = arith.constant 0 : i32
    %c0_i32_0 = arith.constant 0 : i32
    %c0_i32_1 = arith.constant 0 : i32
    return %c0_i32, %c0_i32_0 : i32, i32
  }
  func.func @transform_5(%arg0: i32) -> (i32, i32) {
    %c0_i32 = arith.constant 0 : i32
    %c0_i32_0 = arith.constant 0 : i32
    %c0_i32_1 = arith.constant 0 : i32
    return %c0_i32, %c0_i32_0 : i32, i32
  }
  func.func @transform_6(%arg0: i32) -> (i32, i32) {
    %c0_i32 = arith.constant 0 : i32
    %c0_i32_0 = arith.constant 0 : i32
    %c0_i32_1 = arith.constant 0 : i32
    return %c0_i32, %c0_i32_0 : i32, i32
  }
  func.func @transform_7(%arg0: i32) -> (i32, i32) {
    %c0_i32 = arith.constant 0 : i32
    %c0_i32_0 = arith.constant 0 : i32
    %c0_i32_1 = arith.constant 0 : i32
    return %c0_i32, %c0_i32_0 : i32, i32
  }
  func.func @transform_8(%arg0: i32) -> (i32, i32) {
    %c0_i32 = arith.constant 0 : i32
    %c0_i32_0 = arith.constant 0 : i32
    %c0_i32_1 = arith.constant 0 : i32
    return %c0_i32, %c0_i32_0 : i32, i32
  }
  func.func @transform_9(%arg0: i32) -> (i32, i32) {
    %c0_i32 = arith.constant 0 : i32
    %c0_i32_0 = arith.constant 0 : i32
    %c0_i32_1 = arith.constant 0 : i32
    return %c0_i32, %c0_i32_0 : i32, i32
  }
  func.func @transform_10(%arg0: i32) -> (i32, i32, i32) {
    %c0_i32 = arith.constant 0 : i32
    %c0_i32_0 = arith.constant 0 : i32
    %c0_i32_1 = arith.constant 0 : i32
    return %arg0, %c0_i32, %c0_i32_0 : i32, i32, i32
  }
}

</mosaic_0001>

<bundles_post_ra>
// kernel: _lambda_.1
= control target key start
LH: loop header
LB: loop body
LE: loop exit
PB: predicated region body
PF: predicated region fallthrough
CT: control target
= control target key end

     0   :  { %s1190_s13 = smov 0   ;;  %s1568_s0 = inlined_call_operand.vmem [shape: f32[2,4,64], index: 0, kind: input, shape index: {}]   ;;  %s1569_s1 = inlined_call_operand.vmem [shape: f32[64,256], index: 1, kind: input, shape index: {}]   ;;  %s1570_s2 = inlined_call_operand.vmem [shape: f32[4,256], index: 2, kind: input, shape index: {}]   ;;  %s1571_s3 = inlined_call_operand.vmem [shape: f32[9,256], index: 3, kind: input, shape index: {}]   ;;  %s1572_s4 = inlined_call_operand.vmem [shape: f32[8,4], index: 4, kind: input, shape index: {}]   ;;  %s1573_s5 = inlined_call_operand.vmem [shape: f32[8,1], index: 5, kind: input, shape index: {}]   ;;  %s1574_s6 = inlined_call_operand.vmem [shape: f32[4,72], index: 6, kind: input, shape index: {}]   ;;  %s1575_s7 = inlined_call_operand.vmem [shape: f32[4,1], index: 7, kind: input, shape index: {}]   ;;  %s1576_s8 = inlined_call_operand.vmem [shape: f32[8,36], index: 8, kind: input, shape index: {}]   ;;  %s1577_s9 = inlined_call_operand.vmem [shape: f32[8,1], index: 9, kind: input, shape index: {}]   ;;  %s1578_s10 = inlined_call_operand.vmem [shape: f32[2,8,256], index: 10, kind: output, shape index: {}]  }
   0x1 LB: > { %s1035_s14 = sadd.s32 4294967295, %s1123_s13   ;;  %p1039_p0 = scmp.ge.s32.totalorder %s1123_s13, 1  ;;  %s1123_s13 = sphi %s1190_s13, %s20_s13  }
   0x2   : > { %p311_p1 = scmp.lt.s32.totalorder %s1123_s13, 3 }
   0x4   : > { %p312_p2 = pnand %p1039_p0, %p311_p1 }
   0x5   : > { %v363_v0 = vld [vmem:[%s1569_s1 + $0x8] sm:$0xff] (!%p312_p2)  ;;  %v365_v1 = vld [vmem:[%s1569_s1 + $0x18] sm:$0xff] (!%p312_p2)  ;;  %v362_v2 = vld [vmem:[%s1569_s1] sm:$0xff] (!%p312_p2)  ;;  %v1125_v7 = vmov (!%p312_p2), 0.0   ;;  %p348_p3 = scmp.lt.s32.totalorder (!%p312_p2), %s1035_s14, 1  ;;  %vm378_vm0 = vcmask (!%p312_p2), 523264   ;;  %v553_v35 = vlaneseq (!%p312_p2) }
   0x6   : > { %315 = sbr.rel (%p312_p2) target bundleno = 980 (0x3d4), region = 60  ;;  %v1056_v3 = vpack.c.bf16 (!%p312_p2), %v365_v1, %v363_v0  ;;  %v364_v4 = vld [vmem:[%s1569_s1 + $0x10] sm:$0xff] (!%p312_p2)  ;;  %v367_v5 = vld [vmem:[%s1569_s1 + $0x28] sm:$0xff] (!%p312_p2)  ;;  %v369_v6 = vld [vmem:[%s1569_s1 + $0x38] sm:$0xff] (!%p312_p2)  ;;  %446 = vmatprep.mubr.f32.mxu0 (!%p312_p2), %v1125_v7  ;;  %535 = vmatprep.mubr.f32.mxu1 (!%p312_p2), %v1125_v7  ;;  %vm464_vm1 = vcmask (!%p312_p2), 1043456   ;;  %s1126_s17 = smov (!%p312_p2), 16  }
   0x7   : > { %v1058_v8 = vpack.c.bf16 (!%p312_p2), %v364_v4, %v362_v2  ;;  %v1060_v9 = vpack.c.bf16 (!%p312_p2), %v369_v6, %v367_v5  ;;  %v366_v10 = vld [vmem:[%s1569_s1 + $0x20] sm:$0xff] (!%p312_p2)  ;;  %v368_v11 = vld [vmem:[%s1569_s1 + $0x30] sm:$0xff] (!%p312_p2)  ;;  %v371_v12 = vld [vmem:[%s1569_s1 + $0x48] sm:$0xff] (!%p312_p2)  ;;  %s1127_s18 = smov (!%p312_p2), 17   ;;  %s1128_s19 = smov (!%p312_p2), 15   ;;  %vm460_vm2 = vcmask (!%p312_p2), 31744  }
   0x8   : > { %1057 = vmatprep.subr.bf16.mxu0 (!%p312_p2), %v1056_v3  ;;  %v373_v13 = vld [vmem:[%s1569_s1 + $0x58] sm:$0xff] (!%p312_p2)  ;;  %v1062_v14 = vpack.c.bf16 (!%p312_p2), %v368_v11, %v366_v10  ;;  %v370_v16 = vld [vmem:[%s1569_s1 + $0x40] sm:$0xff] (!%p312_p2)  ;;  %v372_v17 = vld [vmem:[%s1569_s1 + $0x50] sm:$0xff] (!%p312_p2)  ;;  %s1129_s22 = smov (!%p312_p2), 1   ;;  %s1130_s23 = smov (!%p312_p2), 127   ;;  %v1132_v33 = vmov (!%p312_p2), 0  }
   0x9   : > { %1059 = vmatpush1.bf16.msra.mxu0 (!%p312_p2), %v1058_v8  ;;  %v1064_v15 = vpack.c.bf16 (!%p312_p2), %v373_v13, %v371_v12  ;;  %v375_v18 = vld [vmem:[%s1569_s1 + $0x68] sm:$0xff] (!%p312_p2)  ;;  %v377_v19 = vld [vmem:[%s1569_s1 + $0x78] sm:$0xff] (!%p312_p2)  ;;  %v1066_v20 = vpack.c.bf16 (!%p312_p2), %v372_v17, %v370_v16  ;;  %v374_v22 = vld [vmem:[%s1569_s1 + $0x60] sm:$0xff] (!%p312_p2)  ;;  %s1131_s24 = smov (!%p312_p2), 113   ;;  %1114 = vset.pattern.permute.xlu0 (!%p312_p2), %v1132_v33  ;;  %s1133_s25 = smov (!%p312_p2), 112   ;;  %v1305_v38 = vand.u32 (!%p312_p2), 127, %v553_v35 }
   0xa   : > { %1061 = vmatprep.subr.bf16.mxu0 (!%p312_p2), %v1060_v9  ;;  %v1068_v21 = vpack.c.bf16 (!%p312_p2), %v377_v19, %v375_v18  ;;  %v376_v23 = vld [vmem:[%s1569_s1 + $0x70] sm:$0xff] (!%p312_p2)  ;;  %v542_v26 = vld [vmem:[%s1570_s2] sm:$0xff] (!%p312_p2)  ;;  %1115 = vset.pattern.permute.xlu1 (!%p312_p2), %v1132_v33  ;;  %s1134_s26 = smov (!%p312_p2), 111   ;;  %v1307_v39 = vshrl.u32 (!%p312_p2), %v553_v35, 7  ;;  %v1321_v46 = vld [vmem:[%s1571_s3 + $0x8] sm:$0xff] (!%p312_p2)  ;;  %vm703_vm11 = vcmask (!%p312_p2), 588800  }
   0xb   : > { %v1070_v24 = vpack.c.bf16 (!%p312_p2), %v376_v23, %v374_v22  ;;  %v544_v27 = vcombine.low (!%p312_p2), %v542_v26, %v542_v26  ;;  %v453_v32 = vld [vmem:[%s1572_s4] sm:$0xff] (!%p312_p2)  ;;  %vm572_vm3 = vcmp.lt.s32.totalorder (!%p312_p2), %v1305_v38, 16  ;;  %vm589_vm4 = vcmp.lt.s32.totalorder (!%p312_p2), %v1305_v38, 15 }
   0xc   : > { %v697_v34 = vld [vmem:[%s1575_s7] sm:$0xf] (!%p312_p2)  ;;  %v577_v41 = vsub.s32 (!%p312_p2), 1, %v1307_v39  ;;  %v611_v43 = vsub.s32 (!%p312_p2), 3, %v1307_v39  ;;  %v560_v44 = vsub.s32 (!%p312_p2), 0, %v1307_v39  ;;  %v594_v47 = vsub.s32 (!%p312_p2), 2, %v1307_v39 }
   0xd   : > { %s1580_s14 = smov (!%p348_p3, %s1035_s14), 1  ;;  %1063 = vmatpush1.bf16.msra.mxu0 %v1062_v14  ;;  %v1316_v45 = vld [vmem:[%s1571_s3] sm:$0xff]  ;;  %v638_v52 = vsub.s32 5, %v1307_v39  ;;  %vm606_vm5 = vcmp.lt.s32.totalorder %v1305_v38, 1  ;;  %vm555_vm6 = vcmp.lt.s32.totalorder %v1305_v38, 17  ;;  %v621_v60 = vsub.s32 4, %v1307_v39 }
   0xe   : > { %1065 = vmatprep.subr.bf16.mxu0 %v1064_v15  ;;  %s1040_s29 = sshll.u32 %s1580_s14, 2  ;;  %v1325_v48 = vrot.slane %v1316_v45, %v577_v41  ;;  %v1328_v49 = vrot.slane %v1321_v46, %v577_v41  ;;  %v1338_v55 = vrot.slane %v1321_v46, %v611_v43  ;;  %v1342_v56 = vrot.slane %v1316_v45, %v560_v44 }
   0xf   : > { %s351_s12 = scalar_lea.vmem %s1568_s0, %s1040_s29  ;;  %v1345_v57 = vrot.slane %v1321_v46, %v560_v44  ;;  %v1348_v58 = vrot.slane %v1321_v46, %v594_v47  ;;  %v1351_v59 = vrot.slane %v1316_v45, %v611_v43  ;;  %vm633_vm7 = vcmp.lt.s32.totalorder %v1305_v38, 127 }
  0x10   : > { %v361_v25 = vld [vmem:[%s351_s12] sm:$0xf]  ;;  %v1358_v1 = vrot.slane %v1321_v46, %v638_v52  ;;  %v1374_v10 = vrot.slane %v1316_v45, %v594_v47  ;;  %v1377_v11 = vrot.slane %v1321_v46, %v621_v60  ;;  %v1384_v19 = vrot.slane %v1316_v45, %v638_v52 }
  0x11   : > { %1067 = vmatpush1.bf16.msra.mxu0 %v1066_v20  ;;  %vm650_vm8 = vcmp.lt.s32.totalorder %v1305_v38, 113  ;;  %vm667_vm9 = vcmp.lt.s32.totalorder %v1305_v38, 112  ;;  %vm684_vm10 = vcmp.lt.s32.totalorder %v1305_v38, 111  ;;  %vm889_vm14 = vcmask 293888  }
  0x12   : > { %1069 = vmatprep.subr.bf16.mxu0 %v1068_v21  ;;  %v655_v21 = vsub.s32 6, %v1307_v39 }
  0x14   : > { %v1402_v35 = vrot.slane %v1316_v45, %v655_v21 }
  0x15   : > { %1071 = vmatpush1.bf16.msra.mxu0 %v1070_v24 }
  0x18   : > { %1043 = vmatmul.mubr.msk.f32.vlgmr.msra.gmra.mrb[0].mxu0 %vm378_vm0, %v361_v25  ;;  %v672_v25 = vsub.s32 7, %v1307_v39 }
  0x19   : > { %963 = vmatprep.mubr.f32.mxu0 %v1125_v7 }
  0x1a   : > { %v1412_v39 = vrot.slane %v1321_v46, %v672_v25 }
  0xeb   : > { %v448_v28 = vpop.f32.mrb[0].mxu0 }
  0xec   : > { %v1260_v29 = vsel %vm464_vm1, %v448_v28, %v544_v27  ;;  %v450_v30 = vpop.f32.mrb[1].mxu0  ;;  %v1395_v27 = vrot.slane %v1316_v45, %v621_v60 }
  0xed   : > { %568 = vrot.lane.b32.xlu1 %v1260_v29, %s1126_s17  ;;  %549 = vrot.lane.b32.xlu0 %v1260_v29, %s1127_s18  ;;  %v1269_v31 = vsel %vm464_vm1, %v450_v30, %v542_v26 }
  0xee   : > { %1044 = vmatprep.subr.msk.mxu1 %vm464_vm1, %v450_v30 }
  0xef   : > { %1045 = vmatpush1.msk.msra.mxu1 %vm464_vm1, %v448_v28 }
  0xf0   : > { %1046 = vmatmul.mubr.msk.f32.vlgmr.msra.gmra.mrb[0].mxu1 %vm460_vm2, %v453_v32  ;;  %v628_v32 = vmul.f32 %v1377_v11, %v1269_v31 }
  0xf1   : > { %585 = vrot.lane.b32.xlu0 %v1260_v29, %s1128_s19  ;;  %570 = vrot.lane.b32.xlu1 %v1269_v31, %s1126_s17 }
  0xf2   : > { %771 = vmatprep.mubr.f32.mxu1 %v1125_v7 }
  0xf5   : > { %602 = vrot.lane.b32.xlu0 %v1260_v29, %s1129_s22  ;;  %587 = vrot.lane.b32.xlu1 %v1269_v31, %s1128_s19 }
  0xf9   : > { %604 = vrot.lane.b32.xlu1 %v1269_v31, %s1129_s22  ;;  %551 = vrot.lane.b32.xlu0 %v1269_v31, %s1127_s18 }
  0xfd   : > { %631 = vrot.lane.b32.xlu1 %v1269_v31, %s1130_s23  ;;  %629 = vrot.lane.b32.xlu0 %v1260_v29, %s1130_s23 }
 0x101   : > { %648 = vrot.lane.b32.xlu1 %v1269_v31, %s1131_s24  ;;  %646 = vrot.lane.b32.xlu0 %v1260_v29, %s1131_s24 }
 0x105   : > { %665 = vrot.lane.b32.xlu1 %v1269_v31, %s1133_s25  ;;  %663 = vrot.lane.b32.xlu0 %v1260_v29, %s1133_s25 }
 0x109   : > { %682 = vrot.lane.b32.xlu1 %v1269_v31, %s1134_s26  ;;  %680 = vrot.lane.b32.xlu0 %v1260_v29, %s1134_s26  ;;  %v627_v31 = vmul.f32 %v1395_v27, %v1260_v29 }
 0x10d   : > { %700 = vperm.xlu0 %1114, %v697_v34  }
 0x15f   : > { %v569_v36 = vpop.permute.xlu1 %568  ;;  %v550_v37 = vpop.permute.xlu0 %549 }
 0x163   : > { %v586_v40 = vpop.permute.xlu0 %585  ;;  %v571_v42 = vpop.permute.xlu1 %570 }
 0x164   : > { %v573_v53 = vsel %vm572_vm3, %v569_v36, %v571_v42  ;;  %v574_v54 = vsel %vm572_vm3, %v571_v42, %v569_v36  ;;  %v1405_v36 = vrot.slane %v1321_v46, %v655_v21  ;;  %v454_v21 = vld [vmem:[%s1573_s5] sm:$0xff] }
 0x165   : > { %v583_v61 = vmul.f32 %v1325_v48, %v574_v54  ;;  %v584_v62 = vmul.f32 %v1328_v49, %v573_v53  ;;  %v1432_v53 = vld [vmem:[%s1571_s3 + $0x18] ss:$0 sm:$0xff] }
 0x167   : > { %v603_v50 = vpop.permute.xlu0 %602  ;;  %v588_v51 = vpop.permute.xlu1 %587 }
 0x168   : > { %v590_v2 = vsel %vm589_vm4, %v586_v40, %v588_v51  ;;  %v591_v12 = vsel %vm589_vm4, %v588_v51, %v586_v40 }
 0x169   : > { %v601_v13 = vmul.f32 %v1348_v58, %v590_v2  ;;  %v600_v26 = vmul.f32 %v1374_v10, %v591_v12 }
 0x16b   : > { %v605_v63 = vpop.permute.xlu1 %604  ;;  %v552_v0 = vpop.permute.xlu0 %551 }
 0x16c   : > { %v607_v3 = vsel %vm606_vm5, %v603_v50, %v605_v63  ;;  %v556_v4 = vsel %vm555_vm6, %v550_v37, %v552_v0  ;;  %v557_v5 = vsel %vm555_vm6, %v552_v0, %v550_v37  ;;  %v608_v6 = vsel %vm606_vm5, %v605_v63, %v603_v50  ;;  %v1439_v0 = vld [vmem:[%s1571_s3 + $0x10] ss:$0 sm:$0xff] }
 0x16d   : > { %v618_v7 = vmul.f32 %v1338_v55, %v607_v3  ;;  %v566_v8 = vmul.f32 %v1342_v56, %v557_v5  ;;  %v567_v9 = vmul.f32 %v1345_v57, %v556_v4  ;;  %v617_v18 = vmul.f32 %v1351_v59, %v608_v6  ;;  %v548_v5 = vld [vmem:[%s1574_s6] sm:$0xf] }
 0x16e   : > { %v1409_v37 = vrot.slane %v1316_v45, %v672_v25 }
 0x16f   : > { %v1074_v14 = vpack.c.bf16 %v583_v61, %v566_v8  ;;  %v632_v15 = vpop.permute.xlu1 %631  ;;  %v630_v16 = vpop.permute.xlu0 %629  ;;  %v1072_v17 = vpack.c.bf16 %v584_v62, %v567_v9  ;;  %v1076_v24 = vpack.c.bf16 %v618_v7, %v601_v13  ;;  %v1078_v33 = vpack.c.bf16 %v617_v18, %v600_v26 }
 0x170   : > { %v635_v20 = vsel %vm633_vm7, %v632_v15, %v630_v16  ;;  %v634_v22 = vsel %vm633_vm7, %v630_v16, %v632_v15 }
 0x171   : > { %v645_v23 = vmul.f32 %v1358_v1, %v635_v20  ;;  %1073 = vmatprep.subr.bf16.mxu1 %v1072_v17  ;;  %v644_v34 = vmul.f32 %v1384_v19, %v634_v22  ;;  %v883_v20 = vld [vmem:[%s1577_s9] sm:$0xff] }
 0x172   : > { %1075 = vmatpush1.bf16.msra.mxu1 %v1074_v14 }
 0x173   : > { %v649_v28 = vpop.permute.xlu1 %648  ;;  %v647_v30 = vpop.permute.xlu0 %646  ;;  %1077 = vmatprep.subr.bf16.mxu1 %v1076_v24  ;;  %v1080_v40 = vpack.c.bf16 %v645_v23, %v628_v32  ;;  %v1082_v47 = vpack.c.bf16 %v644_v34, %v627_v31 }
 0x174   : > { %v651_v41 = vsel %vm650_vm8, %v647_v30, %v649_v28  ;;  %v652_v42 = vsel %vm650_vm8, %v649_v28, %v647_v30 }
 0x175   : > { %v661_v29 = vmul.f32 %v1402_v35, %v651_v41  ;;  %v662_v50 = vmul.f32 %v1405_v36, %v652_v42 }
 0x176   : > { %1079 = vmatpush1.bf16.msra.mxu1 %v1078_v33 }
 0x177   : > { %v666_v43 = vpop.permute.xlu1 %665  ;;  %v664_v44 = vpop.permute.xlu0 %663  ;;  %1081 = vmatprep.subr.bf16.mxu1 %v1080_v40 }
 0x178   : > { %v668_v45 = vsel %vm667_vm9, %v664_v44, %v666_v43  ;;  %v669_v46 = vsel %vm667_vm9, %v666_v43, %v664_v44 }
 0x179   : > { %v678_v51 = vmul.f32 %v1409_v37, %v668_v45  ;;  %v679_v52 = vmul.f32 %v1412_v39, %v669_v46 }
 0x17a   : > { %1083 = vmatpush1.bf16.msra.mxu1 %v1082_v47 }
 0x17b   : > { %v1086_v54 = vpack.c.bf16 %v678_v51, %v661_v29  ;;  %v683_v60 = vpop.permute.xlu1 %682  ;;  %v681_v61 = vpop.permute.xlu0 %680  ;;  %v1084_v62 = vpack.c.bf16 %v679_v52, %v662_v50 }
 0x17c   : > { %v686_v63 = vsel %vm684_vm10, %v683_v60, %v681_v61  ;;  %v685_v2 = vsel %vm684_vm10, %v681_v61, %v683_v60 }
 0x17d   : > { %v696_v3 = vmul.f32 %v1432_v53, %v686_v63  ;;  %1085 = vmatprep.subr.bf16.mxu1 %v1084_v62  ;;  %v695_v4 = vmul.f32 %v1439_v0, %v685_v2 }
 0x17e   : > { %1087 = vmatpush1.bf16.msra.mxu1 %v1086_v54 }
 0x17f   : > { %723 = vmatprep.subr.mxu1 %v696_v3 }
 0x182   : > { %724 = vmatpush1.msra.mxu1 %v695_v4 }
 0x183   : > { %1049 = vmatmul.mubr.msk.f32.vlgmr.msra.gmra.mrb[2].mxu1 %vm703_vm11, %v548_v5 }
 0x18c   : > { %v701_v8 = vpop.permute.xlu0 %700 }
 0x1c3   : > { %v1448_v6 = vpop.f32.mrb[0].mxu1 }
 0x1c4   : > { %v1450_v7 = vpop.f32.mrb[1].mxu1 }
 0x256   : > { %v773_v9 = vpop.f32.mrb[2].mxu1 }
 0x257   : > { %v774_v12 = vadd.f32 %v773_v9, %v701_v8  ;;  %v775_v13 = vpop.f32.mrb[3].mxu1 }
 0x258   : > { %v776_v14 = vadd.f32 %v775_v13, %v701_v8 }
 0x259   : > { %vm778_vm12 = vcmp.gt.f32.partialorder %v774_v12, 0.0  ;;  %v780_v15 = vmul.f32 0.2, %v774_v12 }
 0x25a   : > { %v781_v17 = vmul.f32 0.2, %v776_v14  ;;  %vm779_vm13 = vcmp.gt.f32.partialorder %v776_v14, 0.0 }
 0x25b   : > { %v1452_v16 = vsel %vm778_vm12, %v774_v12, %v780_v15 }
 0x25c   : > { %809 = vrot.lane.b32.xlu0 %v1452_v16, %s1129_s22  ;;  %793 = vrot.lane.b32.xlu1 %v1452_v16, %s1126_s17  ;;  %v1458_v18 = vsel %vm779_vm13, %v776_v14, %v781_v17 }
 0x260   : > { %785 = vrot.lane.b32.xlu0 %v1452_v16, %s1127_s18  ;;  %795 = vrot.lane.b32.xlu1 %v1458_v18, %s1126_s17 }
 0x264   : > { %801 = vrot.lane.b32.xlu0 %v1452_v16, %s1128_s19  ;;  %811 = vrot.lane.b32.xlu1 %v1458_v18, %s1129_s22 }
 0x268   : > { %819 = vrot.lane.b32.xlu0 %v1452_v16, %s1130_s23  ;;  %787 = vrot.lane.b32.xlu1 %v1458_v18, %s1127_s18 }
 0x26c   : > { %835 = vrot.lane.b32.xlu0 %v1452_v16, %s1133_s25  ;;  %803 = vrot.lane.b32.xlu1 %v1458_v18, %s1128_s19 }
 0x270   : > { %827 = vrot.lane.b32.xlu0 %v1452_v16, %s1131_s24  ;;  %821 = vrot.lane.b32.xlu1 %v1458_v18, %s1130_s23 }
 0x274   : > { %843 = vrot.lane.b32.xlu0 %v1452_v16, %s1134_s26  ;;  %837 = vrot.lane.b32.xlu1 %v1458_v18, %s1133_s25  ;;  %s1055_s25 = sshll.u32 %s1580_s14, 4 }
 0x275   : > { %s356_s30 = scalar_lea.vmem %s1578_s10, %s1055_s25 }
 0x278   : > { %886 = vperm.xlu0 %1114, %v883_v20   ;;  %829 = vrot.lane.b32.xlu1 %v1458_v18, %s1131_s24 }
 0x27c   : > { %845 = vrot.lane.b32.xlu1 %v1458_v18, %s1134_s26 }
 0x280   : > { %457 = vperm.xlu1 %1115, %v454_v21  }
 0x2ce   : > { %v810_v22 = vpop.permute.xlu0 %809  ;;  %v794_v23 = vpop.permute.xlu1 %793 }
 0x2d2   : > { %v786_v24 = vpop.permute.xlu0 %785  ;;  %v796_v25 = vpop.permute.xlu1 %795 }
 0x2d3   : > { %v797_v30 = vsel %vm572_vm3, %v794_v23, %v796_v25  ;;  %v798_v32 = vsel %vm572_vm3, %v796_v25, %v794_v23 }
 0x2d4   : > { %v799_v31 = vmul.f32 %v798_v32, %v1325_v48  ;;  %v800_v41 = vmul.f32 %v797_v30, %v1328_v49 }
 0x2d6   : > { %v802_v26 = vpop.permute.xlu0 %801  ;;  %v812_v28 = vpop.permute.xlu1 %811  ;;  %v853_v51 = vrot.slane %v799_v31, 4  ;;  %v854_v48 = vrot.slane %v800_v41, 4  ;;  %v784_v31 = vld [vmem:[%s1576_s8] sm:$0xff] }
 0x2d7   : > { %v813_v33 = vsel %vm606_vm5, %v810_v22, %v812_v28  ;;  %v814_v34 = vsel %vm606_vm5, %v812_v28, %v810_v22 }
 0x2d8   : > { %v815_v44 = vmul.f32 %v814_v34, %v1351_v59  ;;  %v816_v47 = vmul.f32 %v813_v33, %v1338_v55 }
 0x2da   : > { %v788_v40 = vpop.permute.xlu1 %787  ;;  %v820_v45 = vpop.permute.xlu0 %819  ;;  %v859_v54 = vrot.slane %v815_v44, 4  ;;  %v860_v60 = vrot.slane %v816_v47, 4 }
 0x2db   : > { %v789_v42 = vsel %vm555_vm6, %v786_v24, %v788_v40  ;;  %v790_v43 = vsel %vm555_vm6, %v788_v40, %v786_v24  ;;  %v818_v24 = vmul.f32 %v1458_v18, %v1377_v11 }
 0x2dc   : > { %v791_v46 = vmul.f32 %v790_v43, %v1342_v56  ;;  %v792_v29 = vmul.f32 %v789_v42, %v1345_v57 }
 0x2de   : > { %v804_v50 = vpop.permute.xlu1 %803  ;;  %v875_v61 = vsel %vm464_vm1, %v791_v46, %v853_v51  ;;  %v836_v56 = vpop.permute.xlu0 %835  ;;  %v876_v63 = vsel %vm464_vm1, %v792_v29, %v854_v48 }
 0x2df   : > { %v805_v49 = vsel %vm589_vm4, %v802_v26, %v804_v50  ;;  %v806_v52 = vsel %vm589_vm4, %v804_v50, %v802_v26 }
 0x2e0   : > { %v807_v59 = vmul.f32 %v806_v52, %v1374_v10  ;;  %v808_v55 = vmul.f32 %v805_v49, %v1348_v58 }
 0x2e2   : > { %v877_v57 = vsel %vm464_vm1, %v807_v59, %v859_v54  ;;  %v822_v62 = vpop.permute.xlu1 %821  ;;  %v878_v2 = vsel %vm464_vm1, %v808_v55, %v860_v60  ;;  %v828_v14 = vpop.permute.xlu0 %827 }
 0x2e3   : > { %v823_v3 = vsel %vm633_vm7, %v820_v45, %v822_v62  ;;  %v824_v4 = vsel %vm633_vm7, %v822_v62, %v820_v45  ;;  %v1088_v5 = vpack.c.bf16 %v878_v2, %v876_v63  ;;  %v1090_v10 = vpack.c.bf16 %v877_v57, %v875_v61 }
 0x2e4   : > { %v825_v58 = vmul.f32 %v823_v3, %v1384_v19  ;;  %v826_v8 = vmul.f32 %v824_v4, %v1358_v1  ;;  %v817_v19 = vmul.f32 %v1452_v16, %v1395_v27 }
 0x2e5   : > { %1089 = vmatprep.subr.bf16.mxu0 %v1088_v5 }
 0x2e6   : > { %1091 = vmatpush1.bf16.msra.mxu0 %v1090_v10  ;;  %v838_v9 = vpop.permute.xlu1 %837  ;;  %v865_v20 = vrot.slane %v825_v58, 4  ;;  %v866_v21 = vrot.slane %v826_v8, 4  ;;  %v844_v30 = vpop.permute.xlu0 %843 }
 0x2e7   : > { %v839_v12 = vsel %vm667_vm9, %v836_v56, %v838_v9  ;;  %v840_v13 = vsel %vm667_vm9, %v838_v9, %v836_v56 }
 0x2e8   : > { %v841_v15 = vmul.f32 %v839_v12, %v1409_v37  ;;  %v842_v17 = vmul.f32 %v840_v13, %v1412_v39  ;;  %v879_v28 = vsel %vm464_vm1, %v817_v19, %v865_v20  ;;  %v880_v32 = vsel %vm464_vm1, %v818_v24, %v866_v21 }
 0x2ea   : > { %v830_v22 = vpop.permute.xlu1 %829  ;;  %v871_v25 = vrot.slane %v841_v15, 4  ;;  %v872_v26 = vrot.slane %v842_v17, 4 }
 0x2eb   : > { %v831_v1 = vsel %vm650_vm8, %v828_v14, %v830_v22  ;;  %v832_v23 = vsel %vm650_vm8, %v830_v22, %v828_v14 }
 0x2ec   : > { %v833_v37 = vmul.f32 %v831_v1, %v1402_v35  ;;  %v834_v39 = vmul.f32 %v832_v23, %v1405_v36 }
 0x2ee   : > { %v881_v27 = vsel %vm464_vm1, %v833_v37, %v871_v25  ;;  %v846_v16 = vpop.permute.xlu1 %845  ;;  %v882_v33 = vsel %vm464_vm1, %v834_v39, %v872_v26 }
 0x2ef   : > { %v848_v34 = vsel %vm684_vm10, %v846_v16, %v844_v30  ;;  %v1092_v11 = vpack.c.bf16 %v882_v33, %v880_v32  ;;  %v1094_v18 = vpack.c.bf16 %v881_v27, %v879_v28  ;;  %v847_v36 = vsel %vm684_vm10, %v844_v30, %v846_v16 }
 0x2f0   : > { %v850_v35 = vmul.f32 %v1432_v53, %v848_v34  ;;  %v849_v40 = vmul.f32 %v1439_v0, %v847_v36 }
 0x2f1   : > { %1093 = vmatprep.subr.bf16.mxu0 %v1092_v11 }
 0x2f2   : > { %1095 = vmatpush1.bf16.msra.mxu0 %v1094_v18 }
 0x2f3   : > { %1050 = vmatprep.subr.msk.mxu0 %vm464_vm1, %v850_v35 }
 0x2f6   : > { %1051 = vmatpush1.msk.msra.mxu0 %vm464_vm1, %v849_v40 }
 0x2f7   : > { %1052 = vmatmul.mubr.msk.f32.vlgmr.msra.gmra.mrb[2].mxu0 %vm889_vm14, %v784_v31  ;;  %v887_v41 = vpop.permute.xlu0 %886 }
 0x2ff   : > { %v458_v53 = vpop.permute.xlu1 %457 }
 0x300   : > { %v538_v45 = vadd.f32 %v1448_v6, %v458_v53  ;;  %v540_v46 = vadd.f32 %v1450_v7, %v458_v53 }
 0x3ca   : > { %v965_v42 = vpop.f32.mrb[2].mxu0 }
 0x3cb   : > { %v966_v43 = vadd.f32 %v965_v42, %v887_v41  ;;  %v967_v38 = vpop.f32.mrb[3].mxu0 }
 0x3cc   : > { %v968_v44 = vadd.f32 %v967_v38, %v887_v41 }
 0x3cd   : > { %vm970_vm15 = vcmp.gt.f32.partialorder %v966_v43, 0.0  ;;  %v972_v47 = vmul.f32 0.2, %v966_v43 }
 0x3ce   : > { %vm971_vm0 = vcmp.gt.f32.partialorder %v968_v44, 0.0  ;;  %v973_v0 = vmul.f32 0.2, %v968_v44 }
 0x3cf   : > { %v974_v29 = vsel %vm970_vm15, %v966_v43, %v972_v47 }
 0x3d0   : > { %v976_v50 = vadd.f32 %v974_v29, %v538_v45  ;;  %v975_v51 = vsel %vm971_vm0, %v968_v44, %v973_v0 }
 0x3d1   : > { %v977_v48 = vadd.f32 %v975_v51, %v540_v46 }
 0x3d2   : > { %978 = vst [vmem:[%s356_s30] sm:$0xff] %v976_v50 }
 0x3d3   : > { %979 = vst [vmem:[%s356_s30 + $0x8] sm:$0xff] %v977_v48 }
 0x3d4 PF: > { %s20_s13 = sadd.s32 1, %s1123_s13  }
 0x3d5   : > { %p17_p4 = scmp.ge.s32.totalorder %s20_s13, 4  }
 0x3d7   :  { %19 = sbr.rel (!%p17_p4) target bundleno = 1 (0x1), region = 90 }

</bundles_post_ra>
